<compile_context>
chip_gen: v7x
topology: tpu7x:2x2x1
jax: 0.10.0
libtpu: 0.0.40
codegen_flags: <defaults>
</compile_context>

<pallas_src>
import functools

import jax
import jax.numpy as jnp
from jax.experimental import pallas as pl
from jax.experimental.pallas import tpu as pltpu


_LANE = 128
_TARGET_BLOCK_BYTES = 4 * 1024 * 1024   # ~4 MiB input blocks
_MAX_HW_TILE = 8192                     # multi-step path: lanes per reduction step
_ROWS_PER_PASS = 64                     # rows folded with a register-carried max
_VMEM_LIMIT_BYTES = 48 * 1024 * 1024    # safe on v5e/v6e (128 MiB) and v7x (64 MiB)


def _round_up(n: int, m: int) -> int:
    return ((n + m - 1) // m) * m


def _round_down(n: int, m: int) -> int:
    return (n // m) * m


def _sublane(dtype) -> int:
    # Sub-32-bit dtypes pack along sublanes: native tiles are (8,128) f32,
    # (16,128) bf16, (32,128) int8/fp8.
    return max(8, 32 // jnp.dtype(dtype).itemsize)


def _lowest(dtype):
    """Identity element for max in the given dtype (-inf for floats)."""
    dtype = jnp.dtype(dtype)
    if jnp.issubdtype(dtype, jnp.floating):
        return float("-inf")
    return int(jnp.iinfo(dtype).min)


# ---------------------------------------------------------------------------
# Fast path: the whole HW extent of each row fits in one block.
# ---------------------------------------------------------------------------
def _gmp_single_pass_kernel(x_ref, o_ref):
    # x_ref: (row_tile, hw)  -- minor dim equals the full array dim, so there is
    #                           no block padding and no masking is needed.
    # o_ref: (row_tile, 1)
    o_ref[...] = jnp.max(x_ref[...], axis=-1, keepdims=True).astype(o_ref.dtype)


# ---------------------------------------------------------------------------
# Multi-step path: HW is reduced across several grid steps with a narrow acc.
# ---------------------------------------------------------------------------
def _fold_into_acc(x_ref, acc_ref, row_tile, chunk_plan, fill):
    """Fold the listed 128-lane chunks of x_ref into the narrow running max.

    chunk_plan: static list of (lane_start, valid_width); width < 128 means the
    chunk straddles the end of HW and its invalid lanes are replaced by `fill`.
    """
    for r0 in range(0, row_tile, _ROWS_PER_PASS):
        r1 = min(r0 + _ROWS_PER_PASS, row_tile)
        m = acc_ref[r0:r1, :]                       # narrow (<=64, 128) carry
        for start, width in chunk_plan:             # register-carried fold (VPU)
            chunk = x_ref[r0:r1, start:start + _LANE]
            if width < _LANE:
                lane = jax.lax.broadcasted_iota(jnp.int32, chunk.shape, 1)
                chunk = jnp.where(lane < width, chunk, jnp.asarray(fill, chunk.dtype))
            m = jnp.maximum(m, chunk)
        acc_ref[r0:r1, :] = m


def _gmp_multi_step_kernel(x_ref, o_ref, acc_ref, *, hw, hw_tile, num_hw_steps,
                           row_tile, fill):
    # x_ref:   (row_tile, hw_tile)  block of the (rows, HW) view
    # o_ref:   (row_tile, 1)        resident across HW steps
    # acc_ref: (row_tile, 128)      narrow running max (does not scale with hw_tile)
    k = pl.program_id(1)
    last = num_hw_steps - 1

    @pl.when(k == 0)
    def _init():
        acc_ref[...] = jnp.full(acc_ref.shape, fill, acc_ref.dtype)

    n_chunks = hw_tile // _LANE
    full_plan = [(j * _LANE, _LANE) for j in range(n_chunks)]

    # Static plan for the (possibly partial) last HW step: keep full chunks,
    # mask the single boundary chunk, drop chunks entirely past the end of HW.
    tail_base = last * hw_tile
    tail_plan = []
    for j in range(n_chunks):
        start = tail_base + j * _LANE
        if start >= hw:
            continue
        tail_plan.append((j * _LANE, min(_LANE, hw - start)))

    if tail_plan == full_plan:
        # HW is a multiple of hw_tile: every step is full, no masking anywhere.
        _fold_into_acc(x_ref, acc_ref, row_tile, full_plan, fill)
    else:
        @pl.when(k < last)
        def _full_steps():
            _fold_into_acc(x_ref, acc_ref, row_tile, full_plan, fill)

        @pl.when(k == last)
        def _tail_step():
            _fold_into_acc(x_ref, acc_ref, row_tile, tail_plan, fill)

    @pl.when(k == last)
    def _finalize():
        # One cross-lane (XLU) reduce of the narrow acc per row tile.
        o_ref[...] = jnp.max(acc_ref[...], axis=-1, keepdims=True).astype(o_ref.dtype)


# ---------------------------------------------------------------------------
# Wrapper
# ---------------------------------------------------------------------------
def global_max_pool(x: jax.Array, *, target_block_bytes: int = _TARGET_BLOCK_BYTES) -> jax.Array:
    """Equivalent of GlobalMaxPool.forward: (b, c, h, w) -> (b, c)."""
    if x.ndim != 4:
        raise ValueError("Input must be a 4d tensor. Shape was {}".format(x.shape))
    b, c, h, w = x.shape
    rows, hw = b * c, h * w
    x2 = x.reshape(rows, hw)                        # free row-major reshape

    dtype = x.dtype
    itemsize = jnp.dtype(dtype).itemsize
    sublane = _sublane(dtype)
    rows_padded = _round_up(rows, sublane)
    hw_padded = _round_up(hw, _LANE)                # physical lane padding (VMEM)
    fill = _lowest(dtype)

    # Keep >=2 blocks along the "parallel" rows axis when b*c allows it, so both
    # v7x TensorCores get work (no effect on single-core v5e/v6e).
    two_core_cap = max(sublane, _round_up(pl.cdiv(rows_padded, 2), sublane))

    single_pass = hw_padded * sublane * itemsize <= target_block_bytes

    if single_pass:
        # One grid step per row tile: full HW per block, no scratch, no phases.
        row_budget = max(sublane,
                         _round_down(target_block_bytes // (hw_padded * itemsize), sublane))
        row_tile = min(row_budget, rows_padded, two_core_cap)
        grid = (pl.cdiv(rows, row_tile),)

        y = pl.pallas_call(
            _gmp_single_pass_kernel,
            out_shape=jax.ShapeDtypeStruct((rows, 1), dtype),
            grid_spec=pltpu.PrefetchScalarGridSpec(
                num_scalar_prefetch=0,
                grid=grid,
                in_specs=[pl.BlockSpec((row_tile, hw), lambda i: (i, 0))],
                out_specs=pl.BlockSpec((row_tile, 1), lambda i: (i, 0)),
            ),
            compiler_params=pltpu.CompilerParams(
                dimension_semantics=("parallel",),
                vmem_limit_bytes=_VMEM_LIMIT_BYTES,
            ),
        )(x2)
    else:
        # Huge-HW path: reduce HW across grid steps into a narrow running max.
        hw_tile = max(_LANE,
                      _round_down(target_block_bytes // (sublane * itemsize), _LANE))
        hw_tile = min(hw_tile, _MAX_HW_TILE, hw_padded)
        row_budget = max(sublane,
                         _round_down(target_block_bytes // (hw_tile * itemsize), sublane))
        row_tile = min(row_budget, rows_padded, two_core_cap)
        num_hw_steps = pl.cdiv(hw, hw_tile)
        grid = (pl.cdiv(rows, row_tile), num_hw_steps)

        kernel = functools.partial(
            _gmp_multi_step_kernel,
            hw=hw, hw_tile=hw_tile, num_hw_steps=num_hw_steps,
            row_tile=row_tile, fill=fill,
        )
        y = pl.pallas_call(
            kernel,
            out_shape=jax.ShapeDtypeStruct((rows, 1), dtype),
            grid_spec=pltpu.PrefetchScalarGridSpec(
                num_scalar_prefetch=0,
                grid=grid,
                in_specs=[pl.BlockSpec((row_tile, hw_tile), lambda i, k: (i, k))],
                out_specs=pl.BlockSpec((row_tile, 1), lambda i, k: (i, 0)),
                scratch_shapes=[pltpu.VMEM((row_tile, _LANE), dtype)],
            ),
            compiler_params=pltpu.CompilerParams(
                # rows axis is embarrassingly parallel; HW is the running-max
                # reduction axis (output block resident across it) -> "arbitrary".
                dimension_semantics=("parallel", "arbitrary"),
                vmem_limit_bytes=_VMEM_LIMIT_BYTES,
            ),
        )(x2)

    assert y.shape == (rows, 1)
    return y.reshape(b, c)


def _reference(x: jax.Array) -> jax.Array:
    b, c = x.shape[:2]
    return jnp.max(x.reshape(b, c, -1), axis=-1)


if __name__ == "__main__":
    # Canonical small shape from the module docstring: (b, c, h, w) -> (b, c).
    key = jax.random.PRNGKey(0)
    b, c, h, w = 2, 4, 16, 16
    x = jax.random.normal(key, (b, c, h, w), dtype=jnp.float32)
    y = global_max_pool(x)
    jax.block_until_ready(y)
    assert y.shape == (b, c) and y.dtype == x.dtype
    assert jnp.allclose(y, _reference(x)), "Pallas GlobalMaxPool mismatch (single-pass)"

    # Ragged shape: partial row tile and a non-128-multiple HW extent.
    x_ragged = jax.random.normal(jax.random.PRNGKey(0), (2, 3, 10, 13), dtype=jnp.float32)
    y_ragged = global_max_pool(x_ragged)
    jax.block_until_ready(y_ragged)
    assert y_ragged.shape == (2, 3)
    assert jnp.allclose(y_ragged, _reference(x_ragged)), "Pallas GlobalMaxPool mismatch (ragged)"

    # Force the multi-step (huge-HW) path with a tiny block budget so it is
    # exercised at a small shape: full, masked-partial and skipped tail chunks,
    # plus a partial row tile and accumulator init/finalize phases.
    x_ms = jax.random.normal(jax.random.PRNGKey(0), (2, 3, 30, 41), dtype=jnp.float32)
    y_ms = global_max_pool(x_ms, target_block_bytes=16 * 1024)
    jax.block_until_ready(y_ms)
    assert y_ms.shape == (2, 3)
    assert jnp.allclose(y_ms, _reference(x_ms)), "Pallas GlobalMaxPool mismatch (multi-step)"

    print("KERNEL_OK")
</pallas_src>

<mosaic_0001>
module attributes {stable_mosaic.version = 11 : i64} {
  func.func @_gmp_single_pass_kernel(%arg0: i32, %arg1: memref<8x256xf32, #tpu.memory_space<vmem>>, %arg2: memref<8x1xf32, #tpu.memory_space<vmem>>) attributes {dimension_semantics = [#tpu.dimension_semantics<parallel>], iteration_bounds = array<i64: 1>, scalar_prefetch = 0 : i64, scratch_operands = 0 : i64, tpu.core_type = #tpu.core_type<tc>, window_params = [{transform_indices = @transform_0, window_bounds = array<i64: 8, 256>}, {transform_indices = @transform_1, window_bounds = array<i64: 8, 1>}]} {
    %c0 = arith.constant 0 : index
    %c0_0 = arith.constant 0 : index
    %0 = vector.load %arg1[%c0, %c0_0] : memref<8x256xf32, #tpu.memory_space<vmem>>, vector<8x256xf32>
    %cst = arith.constant dense<0xFF800000> : vector<8xf32>
    %1 = vector.multi_reduction <maximumf>, %0, %cst [1] : vector<8x256xf32> to vector<8xf32>
    %2 = vector.shape_cast %1 : vector<8xf32> to vector<8x1xf32>
    %c0_1 = arith.constant 0 : index
    %c0_2 = arith.constant 0 : index
    %3 = vector.load %arg2[%c0_1, %c0_2] : memref<8x1xf32, #tpu.memory_space<vmem>>, vector<8x1xf32>
    tpu.vector_store %arg2[%c0_1, %c0_2], %2 {strides = array<i32>} : memref<8x1xf32, #tpu.memory_space<vmem>>, vector<8x1xf32>,
    return
  }
  func.func @transform_0(%arg0: i32) -> (i32, i32) {
    %c0_i32 = arith.constant 0 : i32
    %c0_i32_0 = arith.constant 0 : i32
    return %arg0, %c0_i32 : i32, i32
  }
  func.func @transform_1(%arg0: i32) -> (i32, i32) {
    %c0_i32 = arith.constant 0 : i32
    %c0_i32_0 = arith.constant 0 : i32
    return %arg0, %c0_i32 : i32, i32
  }
}

</mosaic_0001>

<bundles_post_ra>
// kernel: tpu_custom_call.1
= control target key start
LH: loop header
LB: loop body
LE: loop exit
PB: predicated region body
PF: predicated region fallthrough
CT: control target
= control target key end

     0   :  { %6 = vsyncpa [#allocation3], 0  ;;  %s57_s6 = smov [#allocation2]   ;;  %s83_s0 = inlined_call_operand.hbm [shape: f32[8,256], index: 0, kind: input, shape index: {}]   ;;  %s84_s1 = inlined_call_operand.vmem [shape: f32[8,1], index: 1, kind: output, shape index: {}]  }
   0x1   :  { %s13_s7 = sshll.u32 %s57_s6, 4  ;;  %s33_s10 = scalar_lea.hbm %s83_s0, 256  ;;  %s14_s7 = int_to_ptr.vmem [resolvable:$true] %s13_s7 }
   0x2   :  { %p34_p0 = scmp.ne.s32.totalorder %s83_s0, %s33_s10  ;;  %p37_p1 = scmp.lt.u32.totalorder %s33_s10, %s83_s0 }
   0x4   :  { %p39_p2 = pnand %p37_p1, %p34_p0 }
   0x6   :  { %42 = shalt.err (!%p39_p2)
}
   0x7   :  { %s43_s15 = scalar_lea.vmem %s14_s7, 256  ;;  %p48_p4 = scmp.lt.s32.totalorder %s14_s7, %s14_s7 }
   0x8   :  { %p44_p3 = scmp.ne.s32.totalorder %s14_s7, %s43_s15  ;;  %p49_p5 = scmp.lt.s32.totalorder %s43_s15, %s43_s15 }
   0xa   :  { %p50_p6 = por %p49_p5, %p48_p4 }
   0xc   :  { %p51_p7 = pnand %p50_p6, %p44_p3 }
   0xe   :  { %54 = shalt.err (!%p51_p7)
}
   0xf   :  { %16 = dma.hbm_to_vmem [thread:$0]  %s83_s0, 256, %s14_s7, [#allocation3]  }
  0x10   :  { %55 = dma.done.wait [#allocation3], 256  }
  0x11   :  { %56 = vsyncadd [#allocation3], 4294967040  ;;  %v20_v0 = vld [vmem:[#allocation2] sm:$0xff]  ;;  %v21_v1 = vld [vmem:[#allocation2 + $0x8] sm:$0xff]  ;;  %vm25_vm0 = vcmask 7168  }
  0x12   :  { %v22_v2 = vmax.f32 %v20_v0, %v21_v1 }
  0x14   :  { %23 = vmax.xlane.f32.xlu0 %v22_v2 }
  0xa1   :  { %v24_v3 = vpop.xlane.xlu0 %23 }
  0xa2   :  { %26 = vst.msk [vmem:[%s84_s1] sm:$0xff] %vm25_vm0, %v24_v3 }
  0xa3   :  { %31 = vsyncpa [#allocation3], 1 }

</bundles_post_ra>
